<compile_context>
chip_gen: v7x
topology: tpu7x:2x2x1
jax: 0.10.0
libtpu: 0.0.40
codegen_flags: <defaults>
</compile_context>

<pallas_src>
import jax
import jax.numpy as jnp
from jax import lax
from jax.experimental import pallas as pl
from jax.experimental.pallas import tpu as pltpu


# -----------------------------------------------------------------------------
# Fused Pallas kernel
# -----------------------------------------------------------------------------
def cnn_cw_fused_kernel(xg_ref, m1_ref, s1_ref, m2_ref, s2_ref,
                        fc_ref, bias_ref, out_ref):
    """
    xg_ref  : (G, Bt, L)          per-group input series (group-major)
    m1_ref  : (G, L, nf1*Lc1)     per-group conv1 Toeplitz, BN1 scale folded (bf16)
    s1_ref  : (G, 1, nf1*Lc1)     conv1 bias + BN1 shift (f32)
    m2_ref  : (G, nf1*Lc1, nf2*Lc2)  avgpool1 + conv2 + BN2 scale folded (bf16)
    s2_ref  : (G, 1, nf2*Lc2)     conv2 bias + BN2 shift (f32)
    fc_ref  : (G, nf2*Lc2, classes)  avgpool2 + flatten + fc1 @ fc2 folded (bf16)
    bias_ref: (1, classes)        fc1_b @ fc2_w.T + fc2_b (f32)
    out_ref : (Bt, classes)
    """
    groups = m1_ref.shape[0]
    wdt = m1_ref.dtype

    acc = jnp.zeros(out_ref.shape, jnp.float32)
    for g in range(groups):  # static unroll over groups (small, e.g. 4)
        xg = xg_ref[g].astype(wdt)                                      # (Bt, L)
        a1 = jnp.dot(xg, m1_ref[g], preferred_element_type=jnp.float32)
        a1 = jnp.maximum(a1 + s1_ref[g], 0.0)                           # ReLU(BN1(conv1))
        a2 = jnp.dot(a1.astype(wdt), m2_ref[g],
                     preferred_element_type=jnp.float32)
        a2 = jnp.maximum(a2 + s2_ref[g], 0.0)                           # ReLU(BN2(conv2(pool1)))
        acc = acc + jnp.dot(a2.astype(wdt), fc_ref[g],
                            preferred_element_type=jnp.float32)         # partial fc1@fc2
    out_ref[...] = (acc + bias_ref[...]).astype(out_ref.dtype)


def cnn_cw_forward_pallas(xg, m1, s1, m2, s2, fc, bias, *, batch_tile=256):
    """Fused pallas_call. Weights are VMEM-resident (constant index maps);
    the batch axis is gridded/pipelined and marked 'parallel' (v7x 2-TC shard).
    VMEM: weights ~0.13 MB bf16 + per-tile activations (few hundred KB at
    batch_tile=256) -- safe on v5e/v6e (128 MiB) and v7x (64 MiB)."""
    G, B, Lg = xg.shape
    classes = fc.shape[-1]
    bt = batch_tile if (B % batch_tile == 0) else B
    grid = (B // bt,)

    const3 = lambda i: (0, 0, 0)
    return pl.pallas_call(
        cnn_cw_fused_kernel,
        out_shape=jax.ShapeDtypeStruct((B, classes), jnp.float32),
        grid_spec=pltpu.PrefetchScalarGridSpec(
            num_scalar_prefetch=0,
            grid=grid,
            in_specs=[
                pl.BlockSpec((G, bt, Lg), lambda i: (0, i, 0)),   # batch-tiled input
                pl.BlockSpec(m1.shape, const3),                   # resident weights
                pl.BlockSpec(s1.shape, const3),
                pl.BlockSpec(m2.shape, const3),
                pl.BlockSpec(s2.shape, const3),
                pl.BlockSpec(fc.shape, const3),
                pl.BlockSpec(bias.shape, lambda i: (0, 0)),
            ],
            out_specs=pl.BlockSpec((bt, classes), lambda i: (i, 0)),
        ),
        compiler_params=pltpu.CompilerParams(
            dimension_semantics=("parallel",)),
    )(xg, m1, s1, m2, s2, fc, bias)


# -----------------------------------------------------------------------------
# Host-side (trace-time) parameter folding -- plain JAX glue, runs once.
# -----------------------------------------------------------------------------
def make_block_diag(w, groups):
    """(Cout, Cin/groups, K) grouped conv weight -> (K, Cout, Cin) block-diag."""
    Cout, ig, K = w.shape
    og = Cout // groups
    Cin = ig * groups
    w_full = jnp.zeros((K, Cout, Cin), w.dtype)
    for g in range(groups):
        blk = jnp.transpose(w[g * og:(g + 1) * og], (2, 0, 1))  # (K, og, ig)
        w_full = w_full.at[:, g * og:(g + 1) * og, g * ig:(g + 1) * ig].set(blk)
    return w_full


def build_fused_params(w1, b1c, g1, be1, rm1, rv1,
                       w2, b2c, g2, be2, rm2, rv2,
                       fc1_w, fc1_b, fc2_w, fc2_b,
                       *, groups, L, K=5, pool1=2, pool2=2, eps=1e-3,
                       weight_dtype=jnp.bfloat16):
    f32 = jnp.float32
    Cout1 = w1.shape[0]
    Cout2 = w2.shape[0]
    Cin = groups * w1.shape[1]
    dim_ff = fc1_w.shape[0]
    og1, ig1 = Cout1 // groups, Cin // groups
    og2, ig2 = Cout2 // groups, Cout1 // groups

    Lc1 = L - K + 1
    Lp1 = (Lc1 - pool1) // pool1 + 1
    Lc2 = Lp1 - K + 1
    Lp2 = (Lc2 - pool2) // pool2 + 1

    # BN(eval) folding: y = conv*scale + shift
    s1 = (g1 / jnp.sqrt(rv1 + eps)).astype(f32)
    sh1 = ((b1c - rm1) * s1 + be1).astype(f32)
    s2 = (g2 / jnp.sqrt(rv2 + eps)).astype(f32)
    sh2 = ((b2c - rm2) * s2 + be2).astype(f32)

    kk = jnp.arange(K)

    # conv1 (valid, k=5) as a Toeplitz matrix, BN1 scale folded in.
    w1_full = make_block_diag(w1, groups).astype(f32)            # (K, Cout1, Cin)
    w1s = w1_full * s1[None, :, None]
    u = jnp.arange(L)
    j = jnp.arange(Lc1)
    T1 = (u[:, None, None] == (j[None, None, :] + kk[None, :, None])).astype(f32)
    M1 = jnp.einsum('ukj,koc->cuoj', T1, w1s).reshape(Cin * L, Cout1 * Lc1)
    S1 = jnp.repeat(sh1, Lc1)[None, :]                           # (1, Cout1*Lc1)

    # avgpool1 (kernel=stride=pool1) folded into conv2; BN2 scale folded in.
    w2_full = make_block_diag(w2, groups).astype(f32)            # (K, Cout2, Cout1)
    w2s = w2_full * (s2 / pool1)[None, :, None]
    t = jnp.arange(Lc1)
    l = jnp.arange(Lc2)
    T2 = ((t[:, None, None] // pool1)
          == (l[None, None, :] + kk[None, :, None])).astype(f32)
    M2 = jnp.einsum('tkl,kqo->otql', T2, w2s).reshape(Cout1 * Lc1, Cout2 * Lc2)
    S2 = jnp.repeat(sh2, Lc2)[None, :]                           # (1, Cout2*Lc2)

    # avgpool2 + flatten (PyTorch channel-major order) folded into fc1 weight.
    fc1_w3 = fc1_w.astype(f32).reshape(dim_ff, Cout2, Lp2)
    t2 = jnp.arange(Lc2)
    m = jnp.arange(Lp2)
    T3 = ((t2[:, None] // pool2) == m[None, :]).astype(f32)
    FC1 = (jnp.einsum('tm,hqm->qth', T3, fc1_w3)
           .reshape(Cout2 * Lc2, dim_ff)) / pool2
    B1 = fc1_b.astype(f32)[None, :]
    FC2 = fc2_w.astype(f32).T
    B2 = fc2_b.astype(f32)[None, :]

    # Exact fc1@fc2 fold (no activation between; dropout is eval-identity).
    FC = FC1 @ FC2                                               # (Cout2*Lc2, classes)
    BIAS = B1 @ FC2 + B2                                         # (1, classes)

    # Keep only the per-group diagonal blocks (off-diagonal blocks are exactly 0).
    def dblk(mat, rstep, cstep, g):
        return mat[g * rstep:(g + 1) * rstep, g * cstep:(g + 1) * cstep]

    M1g = jnp.stack([dblk(M1, ig1 * L, og1 * Lc1, g) for g in range(groups)])
    S1g = jnp.stack([S1[:, g * og1 * Lc1:(g + 1) * og1 * Lc1] for g in range(groups)])
    M2g = jnp.stack([dblk(M2, ig2 * Lc1, og2 * Lc2, g) for g in range(groups)])
    S2g = jnp.stack([S2[:, g * og2 * Lc2:(g + 1) * og2 * Lc2] for g in range(groups)])
    FCg = jnp.stack([FC[g * og2 * Lc2:(g + 1) * og2 * Lc2, :] for g in range(groups)])

    return (M1g.astype(weight_dtype), S1g, M2g.astype(weight_dtype), S2g,
            FCg.astype(weight_dtype), BIAS)


# -----------------------------------------------------------------------------
# Pure-JAX reference (independent lax.conv path, for correctness check)
# -----------------------------------------------------------------------------
def ref_conv_block(x, w, b, gamma, beta, rmean, rvar, eps, groups, pool):
    y = lax.conv_general_dilated(
        x, w, window_strides=(1,), padding="VALID",
        dimension_numbers=("NCW", "OIW", "NCW"),
        feature_group_count=groups)
    y = y + b[None, :, None]
    y = (y - rmean[None, :, None]) / jnp.sqrt(rvar[None, :, None] + eps)
    y = y * gamma[None, :, None] + beta[None, :, None]
    y = jnp.maximum(y, 0.0)
    B, Co, Lc = y.shape
    Lp = (Lc - pool) // pool + 1
    y = y[:, :, :Lp * pool].reshape(B, Co, Lp, pool).mean(axis=-1)
    return y


# -----------------------------------------------------------------------------
# Main
# -----------------------------------------------------------------------------
if __name__ == "__main__":
    # Shapes consistent with CNN_cw(input_dim=4, time_steps=32, classes=3)
    B, C, L = 2, 4, 32
    nf1, nf2, pool1, pool2, dim_ff, classes = 8, 4, 2, 2, 64, 3
    eps = 1e-3
    Cout1, Cout2 = C * nf1, C * nf2                          # 32, 16
    Lc1 = L - 4                                              # 28
    Lp1 = (Lc1 - pool1) // pool1 + 1                         # 14
    Lc2 = Lp1 - 4                                            # 10
    Lp2 = (Lc2 - pool2) // pool2 + 1                         # 5
    F = Cout2 * Lp2                                          # 80 == dim_after_conv

    key = jax.random.PRNGKey(0)
    ks = jax.random.split(key, 20)
    f32 = jnp.float32

    x = jax.random.normal(ks[0], (B, C, L), f32)

    # conv_block 1 params (groups = C, in/group = 1, out/group = nf1)
    w1 = 0.3 * jax.random.normal(ks[1], (Cout1, 1, 5), f32)
    b1 = 0.1 * jax.random.normal(ks[2], (Cout1,), f32)
    g1 = 1.0 + 0.1 * jax.random.normal(ks[3], (Cout1,), f32)
    be1 = 0.1 * jax.random.normal(ks[4], (Cout1,), f32)
    rm1 = 0.1 * jax.random.normal(ks[5], (Cout1,), f32)
    rv1 = 1.0 + 0.5 * jax.random.uniform(ks[6], (Cout1,), f32)

    # conv_block 2 params (groups = C, in/group = nf1, out/group = nf2)
    w2 = 0.3 * jax.random.normal(ks[7], (Cout2, nf1, 5), f32)
    b2 = 0.1 * jax.random.normal(ks[8], (Cout2,), f32)
    g2 = 1.0 + 0.1 * jax.random.normal(ks[9], (Cout2,), f32)
    be2 = 0.1 * jax.random.normal(ks[10], (Cout2,), f32)
    rm2 = 0.1 * jax.random.normal(ks[11], (Cout2,), f32)
    rv2 = 1.0 + 0.5 * jax.random.uniform(ks[12], (Cout2,), f32)

    # MLP params (PyTorch Linear: weight (out, in))
    fc1_w = 0.2 * jax.random.normal(ks[13], (dim_ff, F), f32)
    fc1_b = 0.1 * jax.random.normal(ks[14], (dim_ff,), f32)
    fc2_w = 0.2 * jax.random.normal(ks[15], (classes, dim_ff), f32)
    fc2_b = 0.1 * jax.random.normal(ks[16], (classes,), f32)

    # ---- host-side folding: per-group compact matrices, bf16 weights ----
    M1g, S1g, M2g, S2g, FCg, BIAS = build_fused_params(
        w1, b1, g1, be1, rm1, rv1,
        w2, b2, g2, be2, rm2, rv2,
        fc1_w, fc1_b, fc2_w, fc2_b,
        groups=C, L=L, K=5, pool1=pool1, pool2=pool2, eps=eps,
        weight_dtype=jnp.bfloat16)

    # Group-major input layout: (groups, B, in_per_group*L); in/group = 1 here.
    xg = jnp.transpose(x.reshape(B, C, 1 * L), (1, 0, 2))     # (C, B, L)

    # ---- Pallas forward (single fused kernel) ----
    out = cnn_cw_forward_pallas(xg, M1g, S1g, M2g, S2g, FCg, BIAS)
    out = jax.block_until_ready(out)
    assert out.shape == (B, classes)

    # ---- Reference forward (independent f32 lax.conv path) ----
    r1 = ref_conv_block(x, w1, b1, g1, be1, rm1, rv1, eps, C, pool1)
    r2 = ref_conv_block(r1, w2, b2, g2, be2, rm2, rv2, eps, C, pool2)
    rflat = r2.reshape(B, -1)
    rout = rflat @ fc1_w.T + fc1_b
    rout = rout @ fc2_w.T + fc2_b

    # Tolerance loosened vs. pure-f32 check because weights/activations feed the
    # MXU in bf16 (f32 accumulation); expected error is well below this bound.
    if not jnp.allclose(out, rout, rtol=4e-2, atol=4e-2):
        raise AssertionError(
            f"mismatch: max abs err {jnp.max(jnp.abs(out - rout))}")

    print("KERNEL_OK")
</pallas_src>

<mosaic_0001>
module attributes {stable_mosaic.version = 11 : i64} {
  func.func @cnn_cw_fused_kernel(%arg0: i32, %arg1: memref<4x2x32xf32, #tpu.memory_space<vmem>>, %arg2: memref<4x32x224xbf16, #tpu.memory_space<vmem>>, %arg3: memref<4x1x224xf32, #tpu.memory_space<vmem>>, %arg4: memref<4x224x40xbf16, #tpu.memory_space<vmem>>, %arg5: memref<4x1x40xf32, #tpu.memory_space<vmem>>, %arg6: memref<4x40x3xbf16, #tpu.memory_space<vmem>>, %arg7: memref<1x3xf32, #tpu.memory_space<vmem>>, %arg8: memref<2x3xf32, #tpu.memory_space<vmem>>) attributes {dimension_semantics = [#tpu.dimension_semantics<parallel>], iteration_bounds = array<i64: 1>, scalar_prefetch = 0 : i64, scratch_operands = 0 : i64, tpu.core_type = #tpu.core_type<tc>, window_params = [{transform_indices = @transform_0, window_bounds = array<i64: 4, 2, 32>}, {pipeline_mode = #tpu.pipeline_mode<synchronous>, transform_indices = @transform_1, window_bounds = array<i64: 4, 32, 224>}, {pipeline_mode = #tpu.pipeline_mode<synchronous>, transform_indices = @transform_2, window_bounds = array<i64: 4, 1, 224>}, {pipeline_mode = #tpu.pipeline_mode<synchronous>, transform_indices = @transform_3, window_bounds = array<i64: 4, 224, 40>}, {pipeline_mode = #tpu.pipeline_mode<synchronous>, transform_indices = @transform_4, window_bounds = array<i64: 4, 1, 40>}, {pipeline_mode = #tpu.pipeline_mode<synchronous>, transform_indices = @transform_5, window_bounds = array<i64: 4, 40, 3>}, {pipeline_mode = #tpu.pipeline_mode<synchronous>, transform_indices = @transform_6, window_bounds = array<i64: 1, 3>}, {transform_indices = @transform_7, window_bounds = array<i64: 2, 3>}]} {
    %cst = arith.constant 0.000000e+00 : f32
    %0 = vector.broadcast %cst : f32 to vector<2x3xf32>
    %c0 = arith.constant 0 : index
    %c0_0 = arith.constant 0 : index
    %c0_1 = arith.constant 0 : index
    %1 = vector.load %arg1[%c0, %c0_0, %c0_1] : memref<4x2x32xf32, #tpu.memory_space<vmem>>, vector<1x2x32xf32>
    %2 = vector.shape_cast %1 : vector<1x2x32xf32> to vector<2x32xf32>
    %3 = arith.truncf %2 : vector<2x32xf32> to vector<2x32xbf16>
    %c0_2 = arith.constant 0 : index
    %c0_3 = arith.constant 0 : index
    %c0_4 = arith.constant 0 : index
    %4 = vector.load %arg2[%c0_2, %c0_3, %c0_4] : memref<4x32x224xbf16, #tpu.memory_space<vmem>>, vector<1x32x224xbf16>
    %5 = vector.shape_cast %4 : vector<1x32x224xbf16> to vector<32x224xbf16>
    %cst_5 = arith.constant dense<0.000000e+00> : vector<2x224xf32>
    %6 = tpu.matmul %3, %5, %cst_5 {dimension_numbers = #tpu.dot_dimension_numbers<[1], [0], [0], [1], [0, 0, 1, 1], [], []>} : vector<2x32xbf16>, vector<32x224xbf16>, vector<2x224xf32> -> vector<2x224xf32>
    %c0_6 = arith.constant 0 : index
    %c0_7 = arith.constant 0 : index
    %c0_8 = arith.constant 0 : index
    %7 = vector.load %arg3[%c0_6, %c0_7, %c0_8] : memref<4x1x224xf32, #tpu.memory_space<vmem>>, vector<1x1x224xf32>
    %8 = vector.shape_cast %7 : vector<1x1x224xf32> to vector<1x224xf32>
    %9 = vector.broadcast %8 : vector<1x224xf32> to vector<2x224xf32>
    %10 = arith.addf %6, %9 : vector<2x224xf32>
    %cst_9 = arith.constant 0.000000e+00 : f32
    %11 = vector.broadcast %cst_9 : f32 to vector<2x224xf32>
    %12 = arith.maximumf %10, %11 : vector<2x224xf32>
    %13 = arith.truncf %12 : vector<2x224xf32> to vector<2x224xbf16>
    %c0_10 = arith.constant 0 : index
    %c0_11 = arith.constant 0 : index
    %c0_12 = arith.constant 0 : index
    %14 = vector.load %arg4[%c0_10, %c0_11, %c0_12] : memref<4x224x40xbf16, #tpu.memory_space<vmem>>, vector<1x224x40xbf16>
    %15 = vector.shape_cast %14 : vector<1x224x40xbf16> to vector<224x40xbf16>
    %cst_13 = arith.constant dense<0.000000e+00> : vector<2x40xf32>
    %16 = tpu.matmul %13, %15, %cst_13 {dimension_numbers = #tpu.dot_dimension_numbers<[1], [0], [0], [1], [0, 0, 1, 1], [], []>} : vector<2x224xbf16>, vector<224x40xbf16>, vector<2x40xf32> -> vector<2x40xf32>
    %c0_14 = arith.constant 0 : index
    %c0_15 = arith.constant 0 : index
    %c0_16 = arith.constant 0 : index
    %17 = vector.load %arg5[%c0_14, %c0_15, %c0_16] : memref<4x1x40xf32, #tpu.memory_space<vmem>>, vector<1x1x40xf32>
    %18 = vector.shape_cast %17 : vector<1x1x40xf32> to vector<1x40xf32>
    %19 = vector.broadcast %18 : vector<1x40xf32> to vector<2x40xf32>
    %20 = arith.addf %16, %19 : vector<2x40xf32>
    %cst_17 = arith.constant 0.000000e+00 : f32
    %21 = vector.broadcast %cst_17 : f32 to vector<2x40xf32>
    %22 = arith.maximumf %20, %21 : vector<2x40xf32>
    %23 = arith.truncf %22 : vector<2x40xf32> to vector<2x40xbf16>
    %c0_18 = arith.constant 0 : index
    %c0_19 = arith.constant 0 : index
    %c0_20 = arith.constant 0 : index
    %24 = vector.load %arg6[%c0_18, %c0_19, %c0_20] : memref<4x40x3xbf16, #tpu.memory_space<vmem>>, vector<1x40x3xbf16>
    %25 = vector.shape_cast %24 : vector<1x40x3xbf16> to vector<40x3xbf16>
    %cst_21 = arith.constant dense<0.000000e+00> : vector<2x3xf32>
    %26 = tpu.matmul %23, %25, %cst_21 {dimension_numbers = #tpu.dot_dimension_numbers<[1], [0], [0], [1], [0, 0, 1, 1], [], []>} : vector<2x40xbf16>, vector<40x3xbf16>, vector<2x3xf32> -> vector<2x3xf32>
    %27 = arith.addf %0, %26 : vector<2x3xf32>
    %c1 = arith.constant 1 : index
    %c0_22 = arith.constant 0 : index
    %c0_23 = arith.constant 0 : index
    %28 = vector.load %arg1[%c1, %c0_22, %c0_23] : memref<4x2x32xf32, #tpu.memory_space<vmem>>, vector<1x2x32xf32>
    %29 = vector.shape_cast %28 : vector<1x2x32xf32> to vector<2x32xf32>
    %30 = arith.truncf %29 : vector<2x32xf32> to vector<2x32xbf16>
    %c1_24 = arith.constant 1 : index
    %c0_25 = arith.constant 0 : index
    %c0_26 = arith.constant 0 : index
    %31 = vector.load %arg2[%c1_24, %c0_25, %c0_26] : memref<4x32x224xbf16, #tpu.memory_space<vmem>>, vector<1x32x224xbf16>
    %32 = vector.shape_cast %31 : vector<1x32x224xbf16> to vector<32x224xbf16>
    %cst_27 = arith.constant dense<0.000000e+00> : vector<2x224xf32>
    %33 = tpu.matmul %30, %32, %cst_27 {dimension_numbers = #tpu.dot_dimension_numbers<[1], [0], [0], [1], [0, 0, 1, 1], [], []>} : vector<2x32xbf16>, vector<32x224xbf16>, vector<2x224xf32> -> vector<2x224xf32>
    %c1_28 = arith.constant 1 : index
    %c0_29 = arith.constant 0 : index
    %c0_30 = arith.constant 0 : index
    %34 = vector.load %arg3[%c1_28, %c0_29, %c0_30] : memref<4x1x224xf32, #tpu.memory_space<vmem>>, vector<1x1x224xf32>
    %35 = vector.shape_cast %34 : vector<1x1x224xf32> to vector<1x224xf32>
    %36 = vector.broadcast %35 : vector<1x224xf32> to vector<2x224xf32>
    %37 = arith.addf %33, %36 : vector<2x224xf32>
    %cst_31 = arith.constant 0.000000e+00 : f32
    %38 = vector.broadcast %cst_31 : f32 to vector<2x224xf32>
    %39 = arith.maximumf %37, %38 : vector<2x224xf32>
    %40 = arith.truncf %39 : vector<2x224xf32> to vector<2x224xbf16>
    %c1_32 = arith.constant 1 : index
    %c0_33 = arith.constant 0 : index
    %c0_34 = arith.constant 0 : index
    %41 = vector.load %arg4[%c1_32, %c0_33, %c0_34] : memref<4x224x40xbf16, #tpu.memory_space<vmem>>, vector<1x224x40xbf16>
    %42 = vector.shape_cast %41 : vector<1x224x40xbf16> to vector<224x40xbf16>
    %cst_35 = arith.constant dense<0.000000e+00> : vector<2x40xf32>
    %43 = tpu.matmul %40, %42, %cst_35 {dimension_numbers = #tpu.dot_dimension_numbers<[1], [0], [0], [1], [0, 0, 1, 1], [], []>} : vector<2x224xbf16>, vector<224x40xbf16>, vector<2x40xf32> -> vector<2x40xf32>
    %c1_36 = arith.constant 1 : index
    %c0_37 = arith.constant 0 : index
    %c0_38 = arith.constant 0 : index
    %44 = vector.load %arg5[%c1_36, %c0_37, %c0_38] : memref<4x1x40xf32, #tpu.memory_space<vmem>>, vector<1x1x40xf32>
    %45 = vector.shape_cast %44 : vector<1x1x40xf32> to vector<1x40xf32>
    %46 = vector.broadcast %45 : vector<1x40xf32> to vector<2x40xf32>
    %47 = arith.addf %43, %46 : vector<2x40xf32>
    %cst_39 = arith.constant 0.000000e+00 : f32
    %48 = vector.broadcast %cst_39 : f32 to vector<2x40xf32>
    %49 = arith.maximumf %47, %48 : vector<2x40xf32>
    %50 = arith.truncf %49 : vector<2x40xf32> to vector<2x40xbf16>
    %c1_40 = arith.constant 1 : index
    %c0_41 = arith.constant 0 : index
    %c0_42 = arith.constant 0 : index
    %51 = vector.load %arg6[%c1_40, %c0_41, %c0_42] : memref<4x40x3xbf16, #tpu.memory_space<vmem>>, vector<1x40x3xbf16>
    %52 = vector.shape_cast %51 : vector<1x40x3xbf16> to vector<40x3xbf16>
    %cst_43 = arith.constant dense<0.000000e+00> : vector<2x3xf32>
    %53 = tpu.matmul %50, %52, %cst_43 {dimension_numbers = #tpu.dot_dimension_numbers<[1], [0], [0], [1], [0, 0, 1, 1], [], []>} : vector<2x40xbf16>, vector<40x3xbf16>, vector<2x3xf32> -> vector<2x3xf32>
    %54 = arith.addf %27, %53 : vector<2x3xf32>
    %c2 = arith.constant 2 : index
    %c0_44 = arith.constant 0 : index
    %c0_45 = arith.constant 0 : index
    %55 = vector.load %arg1[%c2, %c0_44, %c0_45] : memref<4x2x32xf32, #tpu.memory_space<vmem>>, vector<1x2x32xf32>
    %56 = vector.shape_cast %55 : vector<1x2x32xf32> to vector<2x32xf32>
    %57 = arith.truncf %56 : vector<2x32xf32> to vector<2x32xbf16>
    %c2_46 = arith.constant 2 : index
    %c0_47 = arith.constant 0 : index
    %c0_48 = arith.constant 0 : index
    %58 = vector.load %arg2[%c2_46, %c0_47, %c0_48] : memref<4x32x224xbf16, #tpu.memory_space<vmem>>, vector<1x32x224xbf16>
    %59 = vector.shape_cast %58 : vector<1x32x224xbf16> to vector<32x224xbf16>
    %cst_49 = arith.constant dense<0.000000e+00> : vector<2x224xf32>
    %60 = tpu.matmul %57, %59, %cst_49 {dimension_numbers = #tpu.dot_dimension_numbers<[1], [0], [0], [1], [0, 0, 1, 1], [], []>} : vector<2x32xbf16>, vector<32x224xbf16>, vector<2x224xf32> -> vector<2x224xf32>
    %c2_50 = arith.constant 2 : index
    %c0_51 = arith.constant 0 : index
    %c0_52 = arith.constant 0 : index
    %61 = vector.load %arg3[%c2_50, %c0_51, %c0_52] : memref<4x1x224xf32, #tpu.memory_space<vmem>>, vector<1x1x224xf32>
    %62 = vector.shape_cast %61 : vector<1x1x224xf32> to vector<1x224xf32>
    %63 = vector.broadcast %62 : vector<1x224xf32> to vector<2x224xf32>
    %64 = arith.addf %60, %63 : vector<2x224xf32>
    %cst_53 = arith.constant 0.000000e+00 : f32
    %65 = vector.broadcast %cst_53 : f32 to vector<2x224xf32>
    %66 = arith.maximumf %64, %65 : vector<2x224xf32>
    %67 = arith.truncf %66 : vector<2x224xf32> to vector<2x224xbf16>
    %c2_54 = arith.constant 2 : index
    %c0_55 = arith.constant 0 : index
    %c0_56 = arith.constant 0 : index
    %68 = vector.load %arg4[%c2_54, %c0_55, %c0_56] : memref<4x224x40xbf16, #tpu.memory_space<vmem>>, vector<1x224x40xbf16>
    %69 = vector.shape_cast %68 : vector<1x224x40xbf16> to vector<224x40xbf16>
    %cst_57 = arith.constant dense<0.000000e+00> : vector<2x40xf32>
    %70 = tpu.matmul %67, %69, %cst_57 {dimension_numbers = #tpu.dot_dimension_numbers<[1], [0], [0], [1], [0, 0, 1, 1], [], []>} : vector<2x224xbf16>, vector<224x40xbf16>, vector<2x40xf32> -> vector<2x40xf32>
    %c2_58 = arith.constant 2 : index
    %c0_59 = arith.constant 0 : index
    %c0_60 = arith.constant 0 : index
    %71 = vector.load %arg5[%c2_58, %c0_59, %c0_60] : memref<4x1x40xf32, #tpu.memory_space<vmem>>, vector<1x1x40xf32>
    %72 = vector.shape_cast %71 : vector<1x1x40xf32> to vector<1x40xf32>
    %73 = vector.broadcast %72 : vector<1x40xf32> to vector<2x40xf32>
    %74 = arith.addf %70, %73 : vector<2x40xf32>
    %cst_61 = arith.constant 0.000000e+00 : f32
    %75 = vector.broadcast %cst_61 : f32 to vector<2x40xf32>
    %76 = arith.maximumf %74, %75 : vector<2x40xf32>
    %77 = arith.truncf %76 : vector<2x40xf32> to vector<2x40xbf16>
    %c2_62 = arith.constant 2 : index
    %c0_63 = arith.constant 0 : index
    %c0_64 = arith.constant 0 : index
    %78 = vector.load %arg6[%c2_62, %c0_63, %c0_64] : memref<4x40x3xbf16, #tpu.memory_space<vmem>>, vector<1x40x3xbf16>
    %79 = vector.shape_cast %78 : vector<1x40x3xbf16> to vector<40x3xbf16>
    %cst_65 = arith.constant dense<0.000000e+00> : vector<2x3xf32>
    %80 = tpu.matmul %77, %79, %cst_65 {dimension_numbers = #tpu.dot_dimension_numbers<[1], [0], [0], [1], [0, 0, 1, 1], [], []>} : vector<2x40xbf16>, vector<40x3xbf16>, vector<2x3xf32> -> vector<2x3xf32>
    %81 = arith.addf %54, %80 : vector<2x3xf32>
    %c3 = arith.constant 3 : index
    %c0_66 = arith.constant 0 : index
    %c0_67 = arith.constant 0 : index
    %82 = vector.load %arg1[%c3, %c0_66, %c0_67] : memref<4x2x32xf32, #tpu.memory_space<vmem>>, vector<1x2x32xf32>
    %83 = vector.shape_cast %82 : vector<1x2x32xf32> to vector<2x32xf32>
    %84 = arith.truncf %83 : vector<2x32xf32> to vector<2x32xbf16>
    %c3_68 = arith.constant 3 : index
    %c0_69 = arith.constant 0 : index
    %c0_70 = arith.constant 0 : index
    %85 = vector.load %arg2[%c3_68, %c0_69, %c0_70] : memref<4x32x224xbf16, #tpu.memory_space<vmem>>, vector<1x32x224xbf16>
    %86 = vector.shape_cast %85 : vector<1x32x224xbf16> to vector<32x224xbf16>
    %cst_71 = arith.constant dense<0.000000e+00> : vector<2x224xf32>
    %87 = tpu.matmul %84, %86, %cst_71 {dimension_numbers = #tpu.dot_dimension_numbers<[1], [0], [0], [1], [0, 0, 1, 1], [], []>} : vector<2x32xbf16>, vector<32x224xbf16>, vector<2x224xf32> -> vector<2x224xf32>
    %c3_72 = arith.constant 3 : index
    %c0_73 = arith.constant 0 : index
    %c0_74 = arith.constant 0 : index
    %88 = vector.load %arg3[%c3_72, %c0_73, %c0_74] : memref<4x1x224xf32, #tpu.memory_space<vmem>>, vector<1x1x224xf32>
    %89 = vector.shape_cast %88 : vector<1x1x224xf32> to vector<1x224xf32>
    %90 = vector.broadcast %89 : vector<1x224xf32> to vector<2x224xf32>
    %91 = arith.addf %87, %90 : vector<2x224xf32>
    %cst_75 = arith.constant 0.000000e+00 : f32
    %92 = vector.broadcast %cst_75 : f32 to vector<2x224xf32>
    %93 = arith.maximumf %91, %92 : vector<2x224xf32>
    %94 = arith.truncf %93 : vector<2x224xf32> to vector<2x224xbf16>
    %c3_76 = arith.constant 3 : index
    %c0_77 = arith.constant 0 : index
    %c0_78 = arith.constant 0 : index
    %95 = vector.load %arg4[%c3_76, %c0_77, %c0_78] : memref<4x224x40xbf16, #tpu.memory_space<vmem>>, vector<1x224x40xbf16>
    %96 = vector.shape_cast %95 : vector<1x224x40xbf16> to vector<224x40xbf16>
    %cst_79 = arith.constant dense<0.000000e+00> : vector<2x40xf32>
    %97 = tpu.matmul %94, %96, %cst_79 {dimension_numbers = #tpu.dot_dimension_numbers<[1], [0], [0], [1], [0, 0, 1, 1], [], []>} : vector<2x224xbf16>, vector<224x40xbf16>, vector<2x40xf32> -> vector<2x40xf32>
    %c3_80 = arith.constant 3 : index
    %c0_81 = arith.constant 0 : index
    %c0_82 = arith.constant 0 : index
    %98 = vector.load %arg5[%c3_80, %c0_81, %c0_82] : memref<4x1x40xf32, #tpu.memory_space<vmem>>, vector<1x1x40xf32>
    %99 = vector.shape_cast %98 : vector<1x1x40xf32> to vector<1x40xf32>
    %100 = vector.broadcast %99 : vector<1x40xf32> to vector<2x40xf32>
    %101 = arith.addf %97, %100 : vector<2x40xf32>
    %cst_83 = arith.constant 0.000000e+00 : f32
    %102 = vector.broadcast %cst_83 : f32 to vector<2x40xf32>
    %103 = arith.maximumf %101, %102 : vector<2x40xf32>
    %104 = arith.truncf %103 : vector<2x40xf32> to vector<2x40xbf16>
    %c3_84 = arith.constant 3 : index
    %c0_85 = arith.constant 0 : index
    %c0_86 = arith.constant 0 : index
    %105 = vector.load %arg6[%c3_84, %c0_85, %c0_86] : memref<4x40x3xbf16, #tpu.memory_space<vmem>>, vector<1x40x3xbf16>
    %106 = vector.shape_cast %105 : vector<1x40x3xbf16> to vector<40x3xbf16>
    %cst_87 = arith.constant dense<0.000000e+00> : vector<2x3xf32>
    %107 = tpu.matmul %104, %106, %cst_87 {dimension_numbers = #tpu.dot_dimension_numbers<[1], [0], [0], [1], [0, 0, 1, 1], [], []>} : vector<2x40xbf16>, vector<40x3xbf16>, vector<2x3xf32> -> vector<2x3xf32>
    %108 = arith.addf %81, %107 : vector<2x3xf32>
    %c0_88 = arith.constant 0 : index
    %c0_89 = arith.constant 0 : index
    %109 = vector.load %arg7[%c0_88, %c0_89] : memref<1x3xf32, #tpu.memory_space<vmem>>, vector<1x3xf32>
    %110 = vector.broadcast %109 : vector<1x3xf32> to vector<2x3xf32>
    %111 = arith.addf %108, %110 : vector<2x3xf32>
    %c0_90 = arith.constant 0 : index
    %c0_91 = arith.constant 0 : index
    %112 = vector.load %arg8[%c0_90, %c0_91] : memref<2x3xf32, #tpu.memory_space<vmem>>, vector<2x3xf32>
    tpu.vector_store %arg8[%c0_90, %c0_91], %111 {strides = array<i32>} : memref<2x3xf32, #tpu.memory_space<vmem>>, vector<2x3xf32>,
    return
  }
  func.func @transform_0(%arg0: i32) -> (i32, i32, i32) {
    %c0_i32 = arith.constant 0 : i32
    %c0_i32_0 = arith.constant 0 : i32
    %c0_i32_1 = arith.constant 0 : i32
    return %c0_i32, %arg0, %c0_i32_0 : i32, i32, i32
  }
  func.func @transform_1(%arg0: i32) -> (i32, i32, i32) {
    %c0_i32 = arith.constant 0 : i32
    %c0_i32_0 = arith.constant 0 : i32
    %c0_i32_1 = arith.constant 0 : i32
    %c0_i32_2 = arith.constant 0 : i32
    return %c0_i32, %c0_i32_0, %c0_i32_1 : i32, i32, i32
  }
  func.func @transform_2(%arg0: i32) -> (i32, i32, i32) {
    %c0_i32 = arith.constant 0 : i32
    %c0_i32_0 = arith.constant 0 : i32
    %c0_i32_1 = arith.constant 0 : i32
    %c0_i32_2 = arith.constant 0 : i32
    return %c0_i32, %c0_i32_0, %c0_i32_1 : i32, i32, i32
  }
  func.func @transform_3(%arg0: i32) -> (i32, i32, i32) {
    %c0_i32 = arith.constant 0 : i32
    %c0_i32_0 = arith.constant 0 : i32
    %c0_i32_1 = arith.constant 0 : i32
    %c0_i32_2 = arith.constant 0 : i32
    return %c0_i32, %c0_i32_0, %c0_i32_1 : i32, i32, i32
  }
  func.func @transform_4(%arg0: i32) -> (i32, i32, i32) {
    %c0_i32 = arith.constant 0 : i32
    %c0_i32_0 = arith.constant 0 : i32
    %c0_i32_1 = arith.constant 0 : i32
    %c0_i32_2 = arith.constant 0 : i32
    return %c0_i32, %c0_i32_0, %c0_i32_1 : i32, i32, i32
  }
  func.func @transform_5(%arg0: i32) -> (i32, i32, i32) {
    %c0_i32 = arith.constant 0 : i32
    %c0_i32_0 = arith.constant 0 : i32
    %c0_i32_1 = arith.constant 0 : i32
    %c0_i32_2 = arith.constant 0 : i32
    return %c0_i32, %c0_i32_0, %c0_i32_1 : i32, i32, i32
  }
  func.func @transform_6(%arg0: i32) -> (i32, i32) {
    %c0_i32 = arith.constant 0 : i32
    %c0_i32_0 = arith.constant 0 : i32
    %c0_i32_1 = arith.constant 0 : i32
    return %c0_i32, %c0_i32_0 : i32, i32
  }
  func.func @transform_7(%arg0: i32) -> (i32, i32) {
    %c0_i32 = arith.constant 0 : i32
    %c0_i32_0 = arith.constant 0 : i32
    return %arg0, %c0_i32 : i32, i32
  }
}

</mosaic_0001>

<bundles_post_ra>
// kernel: tpu_custom_call.1
= control target key start
LH: loop header
LB: loop body
LE: loop exit
PB: predicated region body
PF: predicated region fallthrough
CT: control target
= control target key end

     0   :  { %v1737_v2 = vmov 0   ;;  %vm66_vm0 = vcmask 261120   ;;  %s2195_s0 = inlined_call_operand.vmem [shape: f32[4,2,32], index: 0, kind: input, shape index: {}]   ;;  %s2196_s1 = inlined_call_operand.vmem [shape: bf16[4,32,224], index: 1, kind: input, shape index: {}]   ;;  %s2197_s2 = inlined_call_operand.vmem [shape: f32[4,1,224], index: 2, kind: input, shape index: {}]   ;;  %s2198_s3 = inlined_call_operand.vmem [shape: bf16[4,224,40], index: 3, kind: input, shape index: {}]   ;;  %s2199_s4 = inlined_call_operand.vmem [shape: f32[4,1,40], index: 4, kind: input, shape index: {}]   ;;  %s2200_s5 = inlined_call_operand.vmem [shape: bf16[4,40,3], index: 5, kind: input, shape index: {}]   ;;  %s2201_s6 = inlined_call_operand.vmem [shape: f32[1,3], index: 6, kind: input, shape index: {}]   ;;  %s2202_s7 = inlined_call_operand.hbm [shape: f32[2,3], index: 7, kind: output, shape index: {}]  }
   0x1   :  { %v1621_v0 = vld [vmem:[%s2196_s1 + $0x4] ss:$8 sps:$4 sm:$0xff]   ;;  %v1623_v1 = vld [vmem:[%s2196_s1] ss:$8 sps:$4 sm:$0xff]   ;;  %102 = vmatprep.mubr.bf16.mxu0 %v1737_v2  ;;  %238 = vmatprep.subr.bf16.mxu1 %v1737_v2  ;;  %v1624_v3 = vld [vmem:[%s2196_s1 + $0x14] ss:$8 sps:$4 sm:$0xff]  }
   0x2   :  { %70 = vmatprep.subr.bf16.mxu0 %v1621_v0  ;;  %v1626_v4 = vld [vmem:[%s2196_s1 + $0x10] ss:$8 sps:$4 sm:$0xff]   ;;  %v28_v5 = vld [vmem:[%s2195_s0] sm:$0x3]  ;;  %v1629_v6 = vld [vmem:[%s2196_s1 + $0x24] ss:$8 sps:$4 sm:$0xff]  }
   0x3   :  { %71 = vmatpush1.bf16.msra.mxu0 %v1623_v1  ;;  %v1627_v7 = vld [vmem:[%s2196_s1 + $0x20] ss:$8 sps:$4 sm:$0xff]   ;;  %v29_v8 = vpack.c.bf16 %v28_v5, %v28_v5  ;;  %v1632_v10 = vld [vmem:[%s2196_s1 + $0x34] ss:$8 sps:$4 sm:$0xff]   ;;  %v1630_v12 = vld [vmem:[%s2196_s1 + $0x30] ss:$8 sps:$4 sm:$0xff]  }
   0x4   :  { %72 = vmatprep.subr.bf16.mxu0 %v1624_v3  ;;  %v1633_v9 = vld [vmem:[%s2198_s3] sm:$0xff]   ;;  %v1634_v11 = vld [vmem:[%s2198_s3 + $0x8] sm:$0xff]   ;;  %v1635_v14 = vld [vmem:[%s2198_s3 + $0x10] sm:$0xff]  }
   0x5   :  { %239 = vmatpush1.bf16.msra.mxu1 %v1633_v9  ;;  %v1361_v13 = vld [vmem:[%s2195_s0 + $0x2] sm:$0x3]  ;;  %v1636_v16 = vld [vmem:[%s2198_s3 + $0x70] sm:$0xff]   ;;  %v1637_v17 = vld [vmem:[%s2198_s3 + $0x18] sm:$0xff]  }
   0x6   :  { %240 = vmatprep.subr.bf16.mxu1 %v1737_v2  ;;  %v287_v15 = vpack.c.bf16 %v1361_v13, %v1361_v13  ;;  %v1638_v18 = vld [vmem:[%s2198_s3 + $0x78] sm:$0xff]   ;;  %v1639_v19 = vld [vmem:[%s2198_s3 + $0x20] sm:$0xff]   ;;  %v1641_v21 = vld [vmem:[%s2198_s3 + $0x28] sm:$0xff]  }
   0x7   :  { %73 = vmatpush1.bf16.msra.mxu0 %v1626_v4  ;;  %v1640_v20 = vld [vmem:[%s2198_s3 + $0x80] sm:$0xff]   ;;  %v1642_v22 = vld [vmem:[%s2198_s3 + $0x88] sm:$0xff]   ;;  %v1643_v23 = vld [vmem:[%s2198_s3 + $0x30] sm:$0xff]  }
   0x8   :  { %329 = vmatprep.subr.bf16.mxu0 %v1629_v6  ;;  %v1644_v24 = vld [vmem:[%s2198_s3 + $0x90] sm:$0xff]   ;;  %v1645_v25 = vld [vmem:[%s2198_s3 + $0x38] sm:$0xff]   ;;  %v1647_v27 = vld [vmem:[%s2198_s3 + $0x40] sm:$0xff]  }
   0x9   :  { %241 = vmatpush1.bf16.msra.mxu1 %v1634_v11  ;;  %v1646_v26 = vld [vmem:[%s2198_s3 + $0x98] sm:$0xff]   ;;  %v1648_v28 = vld [vmem:[%s2198_s3 + $0xa0] sm:$0xff]   ;;  %v1649_v29 = vld [vmem:[%s2198_s3 + $0x48] sm:$0xff]  }
   0xa   :  { %1344 = vmatmul.mubr.msk.bf16.vlgmr.msra.gmra.mrb[0].mxu0 %vm66_vm0, %v29_v8  ;;  %242 = vmatprep.subr.bf16.mxu1 %v1737_v2  ;;  %v1650_v30 = vld [vmem:[%s2198_s3 + $0xa8] sm:$0xff]   ;;  %v1651_v31 = vld [vmem:[%s2198_s3 + $0x50] sm:$0xff]   ;;  %v1653_v33 = vld [vmem:[%s2198_s3 + $0x58] sm:$0xff]  }
   0xb   :  { %330 = vmatpush1.bf16.msra.mxu0 %v1627_v7  ;;  %361 = vmatprep.mubr.bf16.mxu0 %v1737_v2  ;;  %v1652_v32 = vld [vmem:[%s2198_s3 + $0xb0] sm:$0xff]   ;;  %v1654_v34 = vld [vmem:[%s2198_s3 + $0xb8] sm:$0xff]  }
   0xc   :  { %331 = vmatprep.subr.bf16.mxu0 %v1632_v10 }
   0xd   :  { %243 = vmatpush1.bf16.msra.mxu1 %v1635_v14 }
   0xe   :  { %244 = vmatprep.subr.bf16.mxu1 %v1737_v2 }
   0xf   :  { %332 = vmatpush1.bf16.msra.mxu0 %v1630_v12 }
  0x10   :  { %498 = vmatprep.subr.bf16.mxu0 %v1737_v2 }
  0x11   :  { %245 = vmatpush1.bf16.msra.mxu1 %v1637_v17 }
  0x12   :  { %1371 = vmatmul.mubr.msk.bf16.vlgmr.msra.gmra.mrb[4].mxu0 %vm66_vm0, %v287_v15  ;;  %246 = vmatprep.subr.bf16.mxu1 %v1737_v2 }
  0x13   :  { %499 = vmatpush1.bf16.msra.mxu0 %v1636_v16 }
  0x14   :  { %500 = vmatprep.subr.bf16.mxu0 %v1737_v2 }
  0x15   :  { %247 = vmatpush1.bf16.msra.mxu1 %v1639_v19 }
  0x16   :  { %248 = vmatprep.subr.bf16.mxu1 %v1737_v2 }
  0x17   :  { %501 = vmatpush1.bf16.msra.mxu0 %v1638_v18 }
  0x18   :  { %502 = vmatprep.subr.bf16.mxu0 %v1737_v2 }
  0x19   :  { %249 = vmatpush1.bf16.msra.mxu1 %v1641_v21 }
  0x1a   :  { %250 = vmatprep.subr.bf16.mxu1 %v1737_v2 }
  0x1b   :  { %503 = vmatpush1.bf16.msra.mxu0 %v1640_v20 }
  0x1c   :  { %504 = vmatprep.subr.bf16.mxu0 %v1737_v2 }
  0x1d   :  { %251 = vmatpush1.bf16.msra.mxu1 %v1643_v23 }
  0x1e   :  { %252 = vmatprep.subr.bf16.mxu1 %v1737_v2 }
  0x1f   :  { %505 = vmatpush1.bf16.msra.mxu0 %v1642_v22 }
  0x20   :  { %506 = vmatprep.subr.bf16.mxu0 %v1737_v2 }
  0x21   :  { %253 = vmatpush1.bf16.msra.mxu1 %v1645_v25 }
  0x22   :  { %254 = vmatprep.subr.bf16.mxu1 %v1737_v2 }
  0x23   :  { %507 = vmatpush1.bf16.msra.mxu0 %v1644_v24 }
  0x24   :  { %508 = vmatprep.subr.bf16.mxu0 %v1737_v2 }
  0x25   :  { %255 = vmatpush1.bf16.msra.mxu1 %v1647_v27 }
  0x26   :  { %256 = vmatprep.subr.bf16.mxu1 %v1737_v2 }
  0x27   :  { %509 = vmatpush1.bf16.msra.mxu0 %v1646_v26 }
  0x28   :  { %510 = vmatprep.subr.bf16.mxu0 %v1737_v2 }
  0x29   :  { %257 = vmatpush1.bf16.msra.mxu1 %v1649_v29 }
  0x2a   :  { %258 = vmatprep.subr.bf16.mxu1 %v1737_v2 }
  0x2b   :  { %511 = vmatpush1.bf16.msra.mxu0 %v1648_v28 }
  0x2c   :  { %512 = vmatprep.subr.bf16.mxu0 %v1737_v2 }
  0x2d   :  { %259 = vmatpush1.bf16.msra.mxu1 %v1651_v31 }
  0x2e   :  { %260 = vmatprep.subr.bf16.mxu1 %v1737_v2 }
  0x2f   :  { %513 = vmatpush1.bf16.msra.mxu0 %v1650_v30 }
  0x30   :  { %514 = vmatprep.subr.bf16.mxu0 %v1737_v2 }
  0x31   :  { %261 = vmatpush1.bf16.msra.mxu1 %v1653_v33 }
  0x32   :  { %262 = vmatprep.subr.bf16.mxu1 %v1737_v2 }
  0x33   :  { %515 = vmatpush1.bf16.msra.mxu0 %v1652_v32 }
  0x34   :  { %516 = vmatprep.subr.bf16.mxu0 %v1737_v2 }
  0x37   :  { %517 = vmatpush1.bf16.msra.mxu0 %v1654_v34 }
  0x38   :  { %518 = vmatprep.subr.bf16.mxu0 %v1737_v2 }
  0x39   :  { %12 = vsyncpa [#allocation3], 0  ;;  %v1655_v35 = vld [vmem:[%s2198_s3 + $0x60] sm:$0xff]   ;;  %v1657_v37 = vld [vmem:[%s2198_s3 + $0x68] sm:$0xff]   ;;  %v36_v42 = vlaneseq  ;;  %vm234_vm1 = vcmask 785408   ;;  %v1738_v24 = vmov 0.0  }
  0x3a   :  { %v1656_v36 = vld [vmem:[%s2198_s3 + $0xc0] sm:$0xff]   ;;  %263 = vmatpush1.bf16.msra.mxu1 %v1655_v35  ;;  %v1658_v38 = vld [vmem:[%s2198_s3 + $0xc8] sm:$0xff]   ;;  %v1659_v39 = vld [vmem:[%s2198_s3 + $0xd0] sm:$0xff]   ;;  %vm565_vm2 = vcmask 1043456   ;;  %vm1739_vm3 = vmmov 0   ;;  %vm561_vm4 = vcmask 326656  }
  0x3b   :  { %519 = vmatpush1.bf16.msra.mxu0 %v1656_v36  ;;  %264 = vmatprep.subr.bf16.mxu1 %v1737_v2  ;;  %v1660_v40 = vld [vmem:[%s2198_s3 + $0xd8] sm:$0xff]   ;;  %v1663_v41 = vld [vmem:[%s2196_s1 + $0x44] ss:$8 sps:$4 sm:$0xff]   ;;  %v37_v43 = vshrl.u32 %v36_v42, 7  ;;  %v34_v45 = vld [vmem:[%s2197_s2] sm:$0x3] }
  0x3c   :  { %520 = vmatprep.subr.bf16.mxu0 %v1737_v2  ;;  %v1366_v54 = vld [vmem:[%s2197_s2 + $0x2] sm:$0x3]  ;;  %v1666_v10 = vld [vmem:[%s2196_s1 + $0x54] ss:$8 sps:$4 sm:$0xff]   ;;  %v1664_v11 = vld [vmem:[%s2196_s1 + $0x50] ss:$8 sps:$4 sm:$0xff]  }
  0x3d   :  { %v1930_v44 = vsub.s32 0, %v37_v43  ;;  %v1935_v46 = vsub.s32 1, %v37_v43  ;;  %v1661_v8 = vld [vmem:[%s2196_s1 + $0x40] ss:$8 sps:$4 sm:$0xff]   ;;  %v1430_v12 = vld [vmem:[%s2195_s0 + $0x4] sm:$0x3] }
  0x3e   :  { %265 = vmatpush1.bf16.msra.mxu1 %v1657_v37  ;;  %v672_v13 = vpack.c.bf16 %v1430_v12, %v1430_v12  ;;  %v1667_v14 = vld [vmem:[%s2198_s3 + $0xe0] sm:$0xff]   ;;  %v1668_v15 = vld [vmem:[%s2198_s3 + $0xe8] sm:$0xff]   ;;  %v1669_v16 = vld [vmem:[%s2198_s3 + $0xf0] sm:$0xff]   ;;  %vm1324_vm5 = vcmask 17408  }
  0x3f   :  { %521 = vmatpush1.bf16.msra.mxu0 %v1658_v38  ;;  %v39_v47 = vrot.slane %v34_v45, %v1930_v44  ;;  %v43_v48 = vrot.slane %v34_v45, %v1935_v46  ;;  %v299_v58 = vrot.slane %v1366_v54, %v1930_v44  ;;  %v303_v60 = vrot.slane %v1366_v54, %v1935_v46  ;;  %v1670_v17 = vld [vmem:[%s2198_s3 + $0xf8] sm:$0xff]   ;;  %v1671_v18 = vld [vmem:[%s2198_s3 + $0x100] sm:$0xff]   ;;  %v1672_v19 = vld [vmem:[%s2198_s3 + $0x108] sm:$0xff]  }
  0x40   :  { %522 = vmatprep.subr.bf16.mxu0 %v1737_v2  ;;  %v1673_v20 = vld [vmem:[%s2198_s3 + $0x110] sm:$0xff]   ;;  %v1674_v21 = vld [vmem:[%s2198_s3 + $0x118] sm:$0xff]   ;;  %v1675_v22 = vld [vmem:[%s2198_s3 + $0x120] sm:$0xff]   ;;  %1577 = vmatprep.subr.bf16.mxu1 %v1738_v24 }
  0x41   :  { %v1676_v23 = vld [vmem:[%s2200_s5 + $0x14] sm:$0xff]   ;;  %v1677_v25 = vld [vmem:[%s2198_s3 + $0x128] sm:$0xff]   ;;  %v1678_v26 = vld [vmem:[%s2200_s5 + $0x1c] sm:$0xff]  }
  0x42   :  { %v1679_v27 = vld [vmem:[%s2198_s3 + $0x130] sm:$0xff]   ;;  %v1680_v28 = vld [vmem:[%s2200_s5 + $0x24] ss:$0 sps:$4 sm:$0xff]   ;;  %v1681_v30 = vld [vmem:[%s2198_s3 + $0x138] sm:$0xff]  }
  0x43   :  { %523 = vmatpush1.bf16.msra.mxu0 %v1659_v39  ;;  %v567_v29 = vsel %vm565_vm2, %v1680_v28, 0  ;;  %v1683_v31 = vld [vmem:[%s2198_s3 + $0x140] sm:$0xff]   ;;  %v1685_v32 = vld [vmem:[%s2198_s3 + $0x148] sm:$0xff]  }
  0x44   :  { %524 = vmatprep.subr.bf16.mxu0 %v1737_v2  ;;  %v1401_v37 = vld [vmem:[%s2199_s4 + $0x1] ss:$0 sm:$0xff]  ;;  %v1435_v42 = vld [vmem:[%s2197_s2 + $0x4] sm:$0x3] }
  0x47   :  { %525 = vmatpush1.bf16.msra.mxu0 %v1660_v40 }
  0x48   :  { %714 = vmatprep.subr.bf16.mxu0 %v1663_v41 }
  0xdd   :  { %v104_v49 = vpop.f32.mrb[0].mxu0 }
  0xde   :  { %v105_v50 = vadd.f32 %v104_v49, %v39_v47  ;;  %v106_v51 = vpop.f32.mrb[1].mxu0  ;;  %v1682_v47 = vld [vmem:[%s2200_s5] sm:$0xff]   ;;  %v684_v49 = vrot.slane %v1435_v42, %v1930_v44 }
  0xdf   :  { %v107_v52 = vadd.f32 %v106_v51, %v43_v48  ;;  %v108_v53 = vpop.f32.mrb[2].mxu0  ;;  %v688_v51 = vrot.slane %v1435_v42, %v1935_v46  ;;  %v1705_v42 = vld [vmem:[%s2198_s3 + $0x198] sm:$0xff]  }
  0xe0   :  { %v111_v55 = vmax.f32 %v105_v50, 0.0  ;;  %v109_v56 = vpop.f32.mrb[3].mxu0  ;;  %v1345_v50 = vld [vmem:[%s2199_s4] ss:$0 sm:$0xff]  ;;  %v1684_v53 = vld [vmem:[%s2200_s5 + $0x8] sm:$0xff]  }
  0xe1   :  { %v112_v57 = vmax.f32 %v107_v52, 0.0 }
  0xe2   :  { %v113_v61 = vpack.c.bf16 %v111_v55, %v111_v55 }
  0xe3   :  { %v114_v59 = vpack.c.bf16 %v112_v57, %v112_v57  ;;  %v1686_v57 = vld [vmem:[%s2200_s5 + $0x10] ss:$0 sps:$4 sm:$0xff]  }
  0xe5   :  { %1360 = vmatprep.mubr.msk.bf16.mxu1 %vm234_vm1, %v114_v59  ;;  %v363_v62 = vpop.f32.mrb[4].mxu0 }
  0xe6   :  { %v364_v63 = vadd.f32 %v363_v62, %v299_v58  ;;  %271 = vmatmul.mubr.bf16.vlgmr.msra.gmra.mrb[0].mxu1 %v113_v61  ;;  %v365_v0 = vpop.f32.mrb[5].mxu0 }
  0xe7   :  { %v366_v1 = vadd.f32 %v365_v0, %v303_v60  ;;  %v367_v3 = vpop.f32.mrb[6].mxu0  ;;  %1578 = vmatpush3.bf16.msra.mxu1 %v1676_v23  ;;  %1583 = vmatprep.mubr.msk.bf16.mxu1 %vm1739_vm3, %v1738_v24  ;;  %v628_v0 = vsel %vm565_vm2, %v1686_v57, 0 }
  0xe8   :  { %v370_v4 = vmax.f32 %v364_v63, 0.0  ;;  %v368_v5 = vpop.f32.mrb[7].mxu0  ;;  %1579 = vmatprep.subr.bf16.mxu1 %v1738_v24 }
  0xe9   :  { %v371_v6 = vmax.f32 %v366_v1, 0.0  ;;  %v1687_v5 = vld [vmem:[%s2200_s5 + $0x28] sm:$0xff]  }
  0xea   :  { %v372_v9 = vpack.c.bf16 %v370_v4, %v370_v4 }
  0xeb   :  { %v373_v7 = vpack.c.bf16 %v371_v6, %v371_v6  ;;  %1580 = vmatpush3.bf16.msra.mxu1 %v1678_v26  ;;  %v1688_v6 = vld [vmem:[%s2200_s5 + $0x30] sm:$0xff]   ;;  %v1690_v26 = vld [vmem:[%s2196_s1 + $0x60] ss:$8 sps:$4 sm:$0xff]  }
  0xec   :  { %1581 = vmatprep.subr.bf16.mxu1 %v1738_v24 }
  0xed   :  { %1416 = vmatprep.mubr.msk.bf16.mxu0 %vm234_vm1, %v373_v7  ;;  %v1689_v7 = vld [vmem:[%s2200_s5 + $0x38] ss:$0 sps:$4 sm:$0xff]  }
  0xee   :  { %531 = vmatmul.mubr.bf16.vlgmr.msra.gmra.mrb[8].mxu0 %v372_v9  ;;  %v1692_v9 = vld [vmem:[%s2196_s1 + $0x64] ss:$8 sps:$4 sm:$0xff]  }
  0xef   :  { %715 = vmatpush1.bf16.msra.mxu0 %v1661_v8  ;;  %746 = vmatprep.mubr.bf16.mxu0 %v1737_v2  ;;  %v950_v8 = vsel %vm565_vm2, %v1689_v7, 0 }
  0xf0   :  { %716 = vmatprep.subr.bf16.mxu0 %v1666_v10  ;;  %1582 = vmatpush3.bf16.msra.mxu1 %v567_v29  ;;  %v1695_v29 = vld [vmem:[%s2196_s1 + $0x74] ss:$8 sps:$4 sm:$0xff]  }
  0xf1   :  { %1587 = vmatprep.subr.bf16.mxu1 %v1738_v24 }
  0xf3   :  { %717 = vmatpush1.bf16.msra.mxu0 %v1664_v11 }
  0xf4   :  { %883 = vmatprep.subr.bf16.mxu0 %v1737_v2 }
  0xf6   :  { %1440 = vmatmul.mubr.msk.bf16.vlgmr.msra.gmra.mrb[12].mxu0 %vm66_vm0, %v672_v13 }
  0xf7   :  { %884 = vmatpush1.bf16.msra.mxu0 %v1667_v14  ;;  %v1470_v14 = vld [vmem:[%s2199_s4 + $0x2] ss:$0 sm:$0xff] }
  0xf8   :  { %885 = vmatprep.subr.bf16.mxu0 %v1737_v2 }
  0xfb   :  { %886 = vmatpush1.bf16.msra.mxu0 %v1668_v15 }
  0xfc   :  { %887 = vmatprep.subr.bf16.mxu0 %v1737_v2 }
  0xff   :  { %888 = vmatpush1.bf16.msra.mxu0 %v1669_v16 }
 0x100   :  { %889 = vmatprep.subr.bf16.mxu0 %v1737_v2 }
 0x103   :  { %890 = vmatpush1.bf16.msra.mxu0 %v1670_v17 }
 0x104   :  { %891 = vmatprep.subr.bf16.mxu0 %v1737_v2 }
 0x107   :  { %892 = vmatpush1.bf16.msra.mxu0 %v1671_v18 }
 0x108   :  { %893 = vmatprep.subr.bf16.mxu0 %v1737_v2 }
 0x10b   :  { %894 = vmatpush1.bf16.msra.mxu0 %v1672_v19 }
 0x10c   :  { %895 = vmatprep.subr.bf16.mxu0 %v1737_v2 }
 0x10f   :  { %896 = vmatpush1.bf16.msra.mxu0 %v1673_v20 }
 0x110   :  { %897 = vmatprep.subr.bf16.mxu0 %v1737_v2 }
 0x113   :  { %898 = vmatpush1.bf16.msra.mxu0 %v1674_v21 }
 0x114   :  { %899 = vmatprep.subr.bf16.mxu0 %v1737_v2 }
 0x117   :  { %900 = vmatpush1.bf16.msra.mxu0 %v1675_v22 }
 0x118   :  { %901 = vmatprep.subr.bf16.mxu0 %v1737_v2 }
 0x11b   :  { %902 = vmatpush1.bf16.msra.mxu0 %v1677_v25 }
 0x11c   :  { %903 = vmatprep.subr.bf16.mxu0 %v1737_v2 }
 0x11f   :  { %904 = vmatpush1.bf16.msra.mxu0 %v1679_v27 }
 0x120   :  { %905 = vmatprep.subr.bf16.mxu0 %v1737_v2 }
 0x123   :  { %906 = vmatpush1.bf16.msra.mxu0 %v1681_v30  ;;  %v1693_v30 = vld [vmem:[%s2196_s1 + $0x70] ss:$8 sps:$4 sm:$0xff]  }
 0x124   :  { %907 = vmatprep.subr.bf16.mxu0 %v1737_v2 }
 0x127   :  { %908 = vmatpush1.bf16.msra.mxu0 %v1683_v31  ;;  %v1495_v31 = vld [vmem:[%s2195_s0 + $0x6] sm:$0x3] }
 0x128   :  { %909 = vmatprep.subr.bf16.mxu0 %v1737_v2 }
 0x12b   :  { %910 = vmatpush1.bf16.msra.mxu0 %v1685_v32  ;;  %v995_v32 = vpack.c.bf16 %v1495_v31, %v1495_v31 }
 0x12c   :  { %1607 = vmatprep.subr.bf16.mxu0 %v1738_v24 }
 0x1b9   :  { %v272_v33 = vpop.f32.mrb[0].mxu1 }
 0x1ba   :  { %v274_v34 = vpop.f32.mrb[1].mxu1  ;;  %v273_v54 = vadd.f32 %v1345_v50, %v272_v33  ;;  %v1696_v33 = vld [vmem:[%s2198_s3 + $0x150] sm:$0xff]  }
 0x1bb   :  { %v275_v35 = vpop.f32.mrb[2].mxu1  ;;  %v1697_v34 = vld [vmem:[%s2198_s3 + $0x158] sm:$0xff]  }
 0x1bc   :  { %v276_v36 = vpop.f32.mrb[3].mxu1  ;;  %v278_v63 = vmax.f32 %v273_v54, 0.0  ;;  %v1698_v35 = vld [vmem:[%s2198_s3 + $0x160] sm:$0xff]  }
 0x1bd   :  { %v1699_v36 = vld [vmem:[%s2198_s3 + $0x168] sm:$0xff]  }
 0x1be   :  { %v279_v4 = vpack.c.bf16 %v278_v63, %v278_v63 }
 0x1c1   :  { %v532_v38 = vpop.f32.mrb[8].mxu0 }
 0x1c2   :  { %v533_v39 = vadd.f32 %v1401_v37, %v532_v38  ;;  %v534_v40 = vpop.f32.mrb[9].mxu0  ;;  %v1700_v37 = vld [vmem:[%s2198_s3 + $0x170] sm:$0xff]   ;;  %v1701_v38 = vld [vmem:[%s2198_s3 + $0x178] sm:$0xff]  }
 0x1c3   :  { %v535_v41 = vpop.f32.mrb[10].mxu0  ;;  %v1703_v40 = vld [vmem:[%s2198_s3 + $0x188] sm:$0xff]  }
 0x1c4   :  { %v538_v43 = vmax.f32 %v533_v39, 0.0  ;;  %v536_v45 = vpop.f32.mrb[11].mxu0  ;;  %v1702_v39 = vld [vmem:[%s2198_s3 + $0x180] sm:$0xff]   ;;  %v1704_v41 = vld [vmem:[%s2198_s3 + $0x190] sm:$0xff]  }
 0x1c5   :  { %v1707_v45 = vld [vmem:[%s2198_s3 + $0x1a8] sm:$0xff]  }
 0x1c6   :  { %v539_v48 = vpack.c.bf16 %v538_v43, %v538_v43  ;;  %v1706_v43 = vld [vmem:[%s2198_s3 + $0x1a0] sm:$0xff]  }
 0x1c8   :  { %1584 = vmatmul.mubr.msk.bf16.vlgmr.msra.gmra.mrb[4].mxu1 %vm561_vm4, %v539_v48  ;;  %v1709_v48 = vld [vmem:[%s2198_s3 + $0x1b8] sm:$0xff]  }
 0x1c9   :  { %1588 = vmatpush3.bf16.msra.mxu1 %v1682_v47  ;;  %v748_v52 = vpop.f32.mrb[12].mxu0  ;;  %1593 = vmatprep.mubr.msk.bf16.mxu1 %vm1739_vm3, %v1738_v24  ;;  %v1708_v47 = vld [vmem:[%s2198_s3 + $0x1b0] sm:$0xff]  }
 0x1ca   :  { %v749_v55 = vadd.f32 %v748_v52, %v684_v49  ;;  %v750_v56 = vpop.f32.mrb[13].mxu0  ;;  %1589 = vmatprep.subr.bf16.mxu1 %v1738_v24  ;;  %v1710_v49 = vld [vmem:[%s2200_s5 + $0x3c] sm:$0xff]  }
 0x1cb   :  { %v751_v58 = vadd.f32 %v750_v56, %v688_v51  ;;  %v752_v59 = vpop.f32.mrb[14].mxu0 }
 0x1cc   :  { %v755_v60 = vmax.f32 %v749_v55, 0.0  ;;  %v753_v61 = vpop.f32.mrb[15].mxu0 }
 0x1cd   :  { %v756_v62 = vmax.f32 %v751_v58, 0.0  ;;  %1590 = vmatpush3.bf16.msra.mxu1 %v1684_v53 }
 0x1ce   :  { %1591 = vmatprep.subr.bf16.mxu1 %v1738_v24  ;;  %v757_v3 = vpack.c.bf16 %v755_v60, %v755_v60 }
 0x1cf   :  { %v758_v1 = vpack.c.bf16 %v756_v62, %v756_v62 }
 0x1d1   :  { %1592 = vmatpush3.bf16.msra.mxu1 %v628_v0  ;;  %1485 = vmatprep.mubr.msk.bf16.mxu0 %vm234_vm1, %v758_v1 }
 0x1d2   :  { %916 = vmatmul.mubr.bf16.vlgmr.msra.gmra.mrb[16].mxu0 %v757_v3  ;;  %1597 = vmatprep.subr.bf16.mxu1 %v1738_v24 }
 0x1d3   :  { %1613 = vmatprep.mubr.msk.bf16.mxu0 %vm1739_vm3, %v1738_v24  ;;  %1608 = vmatpush3.bf16.msra.mxu0 %v1710_v49 }
 0x1d4   :  { %1594 = vmatmul.mubr.msk.bf16.vlgmr.msra.gmra.mrb[8].mxu1 %vm561_vm4, %v279_v4  ;;  %1609 = vmatprep.subr.bf16.mxu0 %v1738_v24  ;;  %v1711_v4 = vld [vmem:[%s2200_s5 + $0x44] sm:$0xff]  }
 0x1d5   :  { %1603 = vmatprep.mubr.msk.bf16.mxu1 %vm1739_vm3, %v1738_v24  ;;  %1598 = vmatpush3.bf16.msra.mxu1 %v1687_v5  ;;  %v1535_v5 = vld [vmem:[%s2199_s4 + $0x3] ss:$0 sm:$0xff] }
 0x1d6   :  { %1599 = vmatprep.subr.bf16.mxu1 %v1738_v24 }
 0x1d7   :  { %1610 = vmatpush3.bf16.msra.mxu0 %v1711_v4 }
 0x1d8   :  { %1611 = vmatprep.subr.bf16.mxu0 %v1738_v24 }
 0x1d9   :  { %1600 = vmatpush3.bf16.msra.mxu1 %v1688_v6 }
 0x1da   :  { %1601 = vmatprep.subr.bf16.mxu1 %v1738_v24 }
 0x1dd   :  { %1602 = vmatpush3.bf16.msra.mxu1 %v950_v8 }
 0x1de   :  { %1037 = vmatprep.subr.bf16.mxu1 %v1692_v9 }
 0x29b   :  { %v603_v10 = vpop.f32.mrb[4].mxu1 }
 0x29c   :  { %v1585_v11 = vpop.f32.mrb[5].mxu1 }
 0x29d   :  { %v606_v12 = vpop.f32.mrb[6].mxu1 }
 0x29e   :  { %v1586_v13 = vpop.f32.mrb[7].mxu1 }
 0x29f   :  { %v1560_v13 = vld [vmem:[%s2201_s6] ss:$0 sm:$0xff] }
 0x2a5   :  { %v917_v15 = vpop.f32.mrb[16].mxu0 }
 0x2a6   :  { %v918_v16 = vadd.f32 %v1470_v14, %v917_v15  ;;  %v919_v17 = vpop.f32.mrb[17].mxu0 }
 0x2a7   :  { %v664_v18 = vpop.f32.mrb[8].mxu1  ;;  %v920_v19 = vpop.f32.mrb[18].mxu0 }
 0x2a8   :  { %v923_v20 = vmax.f32 %v918_v16, 0.0  ;;  %v2084_v21 = vadd.f32 %v664_v18, %v603_v10  ;;  %v1595_v22 = vpop.f32.mrb[9].mxu1  ;;  %v921_v23 = vpop.f32.mrb[19].mxu0 }
 0x2a9   :  { %v667_v25 = vpop.f32.mrb[10].mxu1 }
 0x2aa   :  { %v924_v27 = vpack.c.bf16 %v923_v20, %v923_v20  ;;  %v1596_v28 = vpop.f32.mrb[11].mxu1 }
 0x2ac   :  { %1604 = vmatmul.mubr.msk.bf16.vlgmr.msra.gmra.mrb[12].mxu1 %vm561_vm4, %v924_v27 }
 0x2ad   :  { %1038 = vmatpush1.bf16.msra.mxu1 %v1690_v26  ;;  %1069 = vmatprep.mubr.bf16.mxu1 %v1737_v2 }
 0x2ae   :  { %1039 = vmatprep.subr.bf16.mxu1 %v1695_v29 }
 0x2b1   :  { %1040 = vmatpush1.bf16.msra.mxu1 %v1693_v30 }
 0x2b2   :  { %1206 = vmatprep.subr.bf16.mxu1 %v1737_v2 }
 0x2b4   :  { %1505 = vmatmul.mubr.msk.bf16.vlgmr.msra.gmra.mrb[16].mxu1 %vm66_vm0, %v995_v32 }
 0x2b5   :  { %1207 = vmatpush1.bf16.msra.mxu1 %v1696_v33 }
 0x2b6   :  { %1208 = vmatprep.subr.bf16.mxu1 %v1737_v2 }
 0x2b9   :  { %1209 = vmatpush1.bf16.msra.mxu1 %v1697_v34 }
 0x2ba   :  { %1210 = vmatprep.subr.bf16.mxu1 %v1737_v2 }
 0x2bd   :  { %1211 = vmatpush1.bf16.msra.mxu1 %v1698_v35 }
 0x2be   :  { %1212 = vmatprep.subr.bf16.mxu1 %v1737_v2 }
 0x2c1   :  { %1213 = vmatpush1.bf16.msra.mxu1 %v1699_v36 }
 0x2c2   :  { %1214 = vmatprep.subr.bf16.mxu1 %v1737_v2 }
 0x2c5   :  { %1215 = vmatpush1.bf16.msra.mxu1 %v1700_v37 }
 0x2c6   :  { %1216 = vmatprep.subr.bf16.mxu1 %v1737_v2 }
 0x2c9   :  { %1217 = vmatpush1.bf16.msra.mxu1 %v1701_v38 }
 0x2ca   :  { %1218 = vmatprep.subr.bf16.mxu1 %v1737_v2 }
 0x2cd   :  { %1219 = vmatpush1.bf16.msra.mxu1 %v1702_v39 }
 0x2ce   :  { %1220 = vmatprep.subr.bf16.mxu1 %v1737_v2 }
 0x2d1   :  { %1221 = vmatpush1.bf16.msra.mxu1 %v1703_v40 }
 0x2d2   :  { %1222 = vmatprep.subr.bf16.mxu1 %v1737_v2 }
 0x2d5   :  { %1223 = vmatpush1.bf16.msra.mxu1 %v1704_v41 }
 0x2d6   :  { %1224 = vmatprep.subr.bf16.mxu1 %v1737_v2 }
 0x2d9   :  { %1225 = vmatpush1.bf16.msra.mxu1 %v1705_v42 }
 0x2da   :  { %1226 = vmatprep.subr.bf16.mxu1 %v1737_v2 }
 0x2dd   :  { %1227 = vmatpush1.bf16.msra.mxu1 %v1706_v43 }
 0x2de   :  { %1228 = vmatprep.subr.bf16.mxu1 %v1737_v2 }
 0x2e1   :  { %1229 = vmatpush1.bf16.msra.mxu1 %v1707_v45 }
 0x2e2   :  { %1230 = vmatprep.subr.bf16.mxu1 %v1737_v2 }
 0x2e5   :  { %1231 = vmatpush1.bf16.msra.mxu1 %v1708_v47 }
 0x2e6   :  { %1232 = vmatprep.subr.bf16.mxu1 %v1737_v2  ;;  %v1500_v2 = vld [vmem:[%s2197_s2 + $0x6] sm:$0x3] }
 0x2e7   :  { %v1007_v55 = vrot.slane %v1500_v2, %v1930_v44  ;;  %v1011_v56 = vrot.slane %v1500_v2, %v1935_v46  ;;  %v1712_v44 = vld [vmem:[%s2200_s5 + $0x4c] ss:$0 sps:$4 sm:$0xff]   ;;  %s1740_s5 = smov [#allocation2]  }
 0x2e8   :  { %v1273_v46 = vsel %vm565_vm2, %v1712_v44, 0  ;;  %s1332_s28 = sshll.u32 %s1740_s5, 4  ;;  %s1333_s28 = int_to_ptr.vmem [resolvable:$true] %s1332_s28 }
 0x2e9   :  { %1233 = vmatpush1.bf16.msra.mxu1 %v1709_v48  ;;  %1612 = vmatpush3.bf16.msra.mxu0 %v1273_v46  ;;  %s1713_s4 = scalar_lea.vmem %s1333_s28, 32  ;;  %p1718_p1 = scmp.lt.s32.totalorder %s1333_s28, %s1333_s28 }
 0x2ea   :  { %p1714_p0 = scmp.ne.s32.totalorder %s1333_s28, %s1713_s4  ;;  %p1719_p2 = scmp.lt.s32.totalorder %s1713_s4, %s1713_s4 }
 0x2ec   :  { %p1720_p3 = por %p1719_p2, %p1718_p1 }
 0x2ee   :  { %p1721_p4 = pnand %p1720_p3, %p1714_p0 }
 0x37f   :  { %v986_v50 = vpop.f32.mrb[12].mxu1 }
 0x380   :  { %v992_v51 = vadd.f32 %v986_v50, %v2084_v21  ;;  %v1605_v52 = vpop.f32.mrb[13].mxu1 }
 0x381   :  { %v989_v53 = vpop.f32.mrb[14].mxu1 }
 0x382   :  { %v1606_v54 = vpop.f32.mrb[15].mxu1 }
 0x387   :  { %v1071_v57 = vpop.f32.mrb[16].mxu1 }
 0x388   :  { %v1072_v58 = vadd.f32 %v1071_v57, %v1007_v55  ;;  %v1073_v59 = vpop.f32.mrb[17].mxu1 }
 0x389   :  { %v1074_v60 = vadd.f32 %v1073_v59, %v1011_v56  ;;  %v1075_v61 = vpop.f32.mrb[18].mxu1 }
 0x38a   :  { %v1078_v62 = vmax.f32 %v1072_v58, 0.0  ;;  %v1076_v63 = vpop.f32.mrb[19].mxu1 }
 0x38b   :  { %v1079_v0 = vmax.f32 %v1074_v60, 0.0 }
 0x38c   :  { %v1080_v3 = vpack.c.bf16 %v1078_v62, %v1078_v62 }
 0x38d   :  { %v1081_v1 = vpack.c.bf16 %v1079_v0, %v1079_v0 }
 0x38f   :  { %1550 = vmatprep.mubr.msk.bf16.mxu1 %vm234_vm1, %v1081_v1 }
 0x390   :  { %1239 = vmatmul.mubr.bf16.vlgmr.msra.gmra.mrb[20].mxu1 %v1080_v3 }
 0x463   :  { %v1240_v6 = vpop.f32.mrb[20].mxu1 }
 0x464   :  { %v1241_v7 = vadd.f32 %v1535_v5, %v1240_v6  ;;  %v1242_v8 = vpop.f32.mrb[21].mxu1 }
 0x465   :  { %v1243_v9 = vpop.f32.mrb[22].mxu1 }
 0x466   :  { %v1246_v10 = vmax.f32 %v1241_v7, 0.0  ;;  %v1244_v11 = vpop.f32.mrb[23].mxu1 }
 0x468   :  { %v1247_v12 = vpack.c.bf16 %v1246_v10, %v1246_v10 }
 0x46a   :  { %1614 = vmatmul.mubr.msk.bf16.vlgmr.msra.gmra.mrb[20].mxu0 %vm561_vm4, %v1247_v12 }
 0x53d   :  { %v1309_v24 = vpop.f32.mrb[20].mxu0 }
 0x53e   :  { %v1315_v14 = vadd.f32 %v1309_v24, %v992_v51  ;;  %v1615_v15 = vpop.f32.mrb[21].mxu0 }
 0x53f   :  { %v1312_v16 = vpop.f32.mrb[22].mxu0 }
 0x540   :  { %v1323_v17 = vadd.f32 %v1560_v13, %v1315_v14  ;;  %v1616_v18 = vpop.f32.mrb[23].mxu0 }
 0x542   :  { %1325 = vst.msk [vmem:[#allocation2] sm:$0x3] %vm1324_vm5, %v1323_v17 }
 0x543   :  { %1724 = shalt.err (!%p1721_p4)
}
 0x544   :  { %s1725_s6 = scalar_lea.hbm %s2202_s7, 32 }
 0x545   :  { %p1726_p5 = scmp.ne.s32.totalorder %s2202_s7, %s1725_s6  ;;  %p1729_p6 = scmp.lt.u32.totalorder %s1725_s6, %s2202_s7 }
 0x547   :  { %p1731_p7 = pnand %p1729_p6, %p1726_p5 }
 0x549   :  { %1734 = shalt.err (!%p1731_p7)
}
 0x54a   :  { %1335 = dma.vmem_to_hbm [thread:$0]  %s1333_s28, 32, %s2202_s7, [#allocation3]  }
 0x54b   :  { %1735 = dma.done.wait [#allocation3], 32  }
 0x54c   :  { %1736 = vsyncadd [#allocation3], 4294967264 }
 0x54d   :  { %1339 = vsyncpa [#allocation3], 1 }

</bundles_post_ra>
